<compile_context>
chip_gen: v5e
topology: v5e:2x2
jax: 0.10.0
libtpu: 0.0.40
codegen_flags: <defaults>
</compile_context>

<pallas_src>
import jax
import jax.numpy as jnp
from jax.experimental import pallas as pl
from jax.experimental.pallas import tpu as pltpu

_MB = 1024 * 1024


# ---------------------------------------------------------------------------
# Kernels
# ---------------------------------------------------------------------------
def _reduce_hidden_kernel(x_ref, w1_ref, s1_ref, b1_ref,
                          w2_ref, s2_ref, b2_ref, r_ref, h_ref):
    # x_ref: (1, Cin, TP) f32   w1: (RC, Cin) bf16   s1/b1: (RC, 1) f32
    # w2: (RC, RC) bf16         s2/b2: (RC, 1) f32
    # r_ref/h_ref: (1, RC, TP) bf16
    x = x_ref[0].astype(jnp.bfloat16)                                 # (Cin, TP)

    # conv_reduce: 1x1 conv (channel matmul) + folded BN affine + ReLU (f32 math)
    r = jnp.dot(w1_ref[...], x, preferred_element_type=jnp.float32)  # (RC, TP)
    r = jnp.maximum(r * s1_ref[...] + b1_ref[...], 0.0)
    r_bf = r.astype(jnp.bfloat16)
    r_ref[0] = r_bf

    # attention[0]: ConvBNReLU (RC -> RC)
    h = jnp.dot(w2_ref[...], r_bf, preferred_element_type=jnp.float32)
    h = jnp.maximum(h * s2_ref[...] + b2_ref[...], 0.0)
    h_ref[0] = h.astype(jnp.bfloat16)


def _attention_apply_kernel(r_ref, h_ref, w3_ref, o_ref):
    # r_ref: (1, RC, HW) bf16 (resident per batch)   h_ref: (1, RC, TP) bf16
    # w3:    (HW, RC) bf16                           o_ref: (1, RC, TP) f32
    # attention[1]: 1x1 conv RC -> Cout(==HW), only for this spatial tile's columns
    a = jnp.dot(w3_ref[...], h_ref[0], preferred_element_type=jnp.float32)  # (HW, TP)

    # torch.softmax(attention.view(N, Cout, HW), dim=1): softmax over the
    # attention-channel axis == rows of `a` in channel-major layout.
    a = a - jnp.max(a, axis=0, keepdims=True)
    e = jnp.exp(a)                                                    # (HW, TP) f32
    denom = jnp.sum(e, axis=0, keepdims=True)                         # (1, TP)

    # fm = reduce_x @ softmax; normalization deferred to the small (RC, TP) result.
    fm = jnp.dot(r_ref[0], e.astype(jnp.bfloat16),
                 preferred_element_type=jnp.float32)                  # (RC, TP)
    o_ref[0] = (fm * pl.reciprocal(denom, approx=True)).astype(o_ref.dtype)


# ---------------------------------------------------------------------------
# Wrapper
# ---------------------------------------------------------------------------
def _pick_tile_p(HW):
    # Prefer lane-dense (multiple-of-128) spatial tiles that divide HW.
    for tp in (512, 384, 256, 128):
        if HW % tp == 0:
            return tp
    return HW  # small / irregular HW: single full tile


def _vmem_limit_bytes(estimate):
    try:
        cap = int(pltpu.get_tpu_info().vmem_capacity_bytes) - 16 * _MB
    except Exception:
        cap = 48 * _MB                      # safe on every generation (v7x: 64 MiB/TC)
    return int(max(min(2 * estimate + 8 * _MB, cap), 32 * _MB))


def _stage1_vmem(Cin, RC, TP):
    f32, bf16 = 4, 2
    io = 2 * (Cin * TP * f32 + 2 * RC * TP * bf16)          # double-buffered x + r,h
    wts = 2 * (RC * Cin * bf16 + RC * RC * bf16 + 4 * RC * f32)
    tmp = 4 * RC * TP * f32
    return io + wts + tmp


def _stage2_vmem(HW, RC, TP):
    f32, bf16 = 4, 2
    io = 2 * (RC * HW * bf16 + RC * TP * bf16 + RC * TP * f32)
    wts = 2 * (HW * RC * bf16)
    tmp = 3 * HW * TP * f32 + HW * TP * bf16 + 2 * RC * TP * f32
    return io + wts + tmp


def attention_generation(x_nchw, params, *, tile_p=None):
    """x_nchw: (N, Cin, H, W) float32.  Returns (N, RC, H, W) like PyTorch."""
    N, Cin, H, W = x_nchw.shape
    HW = H * W
    RC = params["w1"].shape[0]
    assert params["w3"].shape[0] == HW, "out_channels must equal H*W for the bmm"

    TP = tile_p if tile_p is not None else _pick_tile_p(HW)
    assert HW % TP == 0
    P = HW // TP

    # Channel-major slabs: NCHW is already (N, Cin, HW) after a free reshape.
    x = x_nchw.reshape(N, Cin, HW)

    # Weights in natural PyTorch 1x1-conv shapes, cast to bf16 for the MXU.
    w1 = params["w1"].astype(jnp.bfloat16)            # (RC, Cin)
    w2 = params["w2"].astype(jnp.bfloat16)            # (RC, RC)
    w3 = params["w3"].astype(jnp.bfloat16)            # (HW, RC)
    s1, b1 = params["s1"], params["b1"]               # (RC, 1) f32
    s2, b2 = params["s2"], params["b2"]               # (RC, 1) f32

    # ---- stage 1: reduce_x and hidden (per spatial tile, fully parallel) ----
    r_bf, h_bf = pl.pallas_call(
        _reduce_hidden_kernel,
        out_shape=(jax.ShapeDtypeStruct((N, RC, HW), jnp.bfloat16),
                   jax.ShapeDtypeStruct((N, RC, HW), jnp.bfloat16)),
        grid_spec=pltpu.PrefetchScalarGridSpec(
            num_scalar_prefetch=0,
            grid=(N, P),
            in_specs=[
                pl.BlockSpec((1, Cin, TP), lambda b, p: (b, 0, p)),   # x tile
                pl.BlockSpec((RC, Cin),    lambda b, p: (0, 0)),      # w1
                pl.BlockSpec((RC, 1),      lambda b, p: (0, 0)),      # s1
                pl.BlockSpec((RC, 1),      lambda b, p: (0, 0)),      # b1
                pl.BlockSpec((RC, RC),     lambda b, p: (0, 0)),      # w2
                pl.BlockSpec((RC, 1),      lambda b, p: (0, 0)),      # s2
                pl.BlockSpec((RC, 1),      lambda b, p: (0, 0)),      # b2
            ],
            out_specs=(pl.BlockSpec((1, RC, TP), lambda b, p: (b, 0, p)),
                       pl.BlockSpec((1, RC, TP), lambda b, p: (b, 0, p))),
        ),
        compiler_params=pltpu.CompilerParams(
            dimension_semantics=("parallel", "parallel"),
            vmem_limit_bytes=_vmem_limit_bytes(_stage1_vmem(Cin, RC, TP))),
    )(x, w1, s1, b1, w2, s2, b2)

    # ---- stage 2: attention + softmax + bmm, tiled over output columns ----
    fm = pl.pallas_call(
        _attention_apply_kernel,
        out_shape=jax.ShapeDtypeStruct((N, RC, HW), jnp.float32),
        grid_spec=pltpu.PrefetchScalarGridSpec(
            num_scalar_prefetch=0,
            grid=(N, P),
            in_specs=[
                pl.BlockSpec((1, RC, HW), lambda b, p: (b, 0, 0)),    # reduce_x (full)
                pl.BlockSpec((1, RC, TP), lambda b, p: (b, 0, p)),    # hidden tile
                pl.BlockSpec((HW, RC),    lambda b, p: (0, 0)),       # w3
            ],
            out_specs=pl.BlockSpec((1, RC, TP), lambda b, p: (b, 0, p)),
        ),
        compiler_params=pltpu.CompilerParams(
            dimension_semantics=("parallel", "parallel"),
            vmem_limit_bytes=_vmem_limit_bytes(_stage2_vmem(HW, RC, TP))),
    )(r_bf, h_bf, w3)

    # Output is already channel-major (N, RC, HW): only a free reshape to NCHW.
    return fm.reshape(N, RC, H, W)


# ---------------------------------------------------------------------------
# Reference & test
# ---------------------------------------------------------------------------
def _reference(x_nchw, params):
    """Plain-JAX f32 reference mirroring the PyTorch forward exactly."""
    N, Cin, H, W = x_nchw.shape
    HW = H * W
    RC = params["w1"].shape[0]
    x = x_nchw.reshape(N, Cin, HW)                                        # (N, Cin, HW)
    r = jnp.maximum(jnp.einsum("ic,ncp->nip", params["w1"], x)
                    * params["s1"][None] + params["b1"][None], 0.0)       # (N, RC, HW)
    h = jnp.maximum(jnp.einsum("ji,nip->njp", params["w2"], r)
                    * params["s2"][None] + params["b2"][None], 0.0)       # (N, RC, HW)
    a = jnp.einsum("cj,njp->ncp", params["w3"], h)                        # (N, Cout, HW)
    s = jax.nn.softmax(a, axis=1)                                         # over channels
    fm = jnp.einsum("nik,nkp->nip", r, s)                                 # (N, RC, HW)
    return fm.reshape(N, RC, H, W)


def _make_params(key, in_channels, reduced_channels, out_channels):
    ks = jax.random.split(key, 7)
    eps = 1e-5
    # 1x1 conv weights in natural PyTorch (out, in) shapes, bias=False.
    w1 = jax.random.normal(ks[0], (reduced_channels, in_channels), jnp.float32) * 0.1
    w2 = jax.random.normal(ks[1], (reduced_channels, reduced_channels), jnp.float32) * 0.1
    w3 = jax.random.normal(ks[2], (out_channels, reduced_channels), jnp.float32) * 0.1
    # Folded eval-mode BatchNorm.
    g1 = 1.0 + 0.05 * jax.random.normal(ks[3], (reduced_channels,), jnp.float32)
    b1 = 0.05 * jax.random.normal(ks[4], (reduced_channels,), jnp.float32)
    g2 = 1.0 + 0.05 * jax.random.normal(ks[5], (reduced_channels,), jnp.float32)
    b2 = 0.05 * jax.random.normal(ks[6], (reduced_channels,), jnp.float32)
    mean1 = jnp.zeros((reduced_channels,), jnp.float32)
    var1 = jnp.ones((reduced_channels,), jnp.float32)
    mean2 = jnp.zeros((reduced_channels,), jnp.float32)
    var2 = jnp.ones((reduced_channels,), jnp.float32)
    s1 = g1 / jnp.sqrt(var1 + eps)
    s2 = g2 / jnp.sqrt(var2 + eps)
    return {
        "w1": w1,
        "s1": s1.reshape(-1, 1), "b1": (b1 - mean1 * s1).reshape(-1, 1),
        "w2": w2,
        "s2": s2.reshape(-1, 1), "b2": (b2 - mean2 * s2).reshape(-1, 1),
        "w3": w3,
    }


def _check(x, params, tile_p=None, tol=2e-2):
    fm = jax.block_until_ready(attention_generation(x, params, tile_p=tile_p))
    ref = _reference(x, params)
    assert fm.shape == ref.shape
    err = float(jnp.max(jnp.abs(fm - ref)))
    assert jnp.allclose(fm, ref, atol=tol, rtol=tol), f"max abs err = {err}"


if __name__ == "__main__":
    key = jax.random.PRNGKey(0)
    k1, k2, k3, k4 = jax.random.split(key, 4)

    # Case 1: small shapes (out_channels must equal H*W for the bmm).
    N, Cin, H, W, RC = 2, 8, 8, 8, 16
    x = jax.random.normal(k1, (N, Cin, H, W), jnp.float32)
    params = _make_params(k2, Cin, RC, H * W)
    _check(x, params)

    # Case 2: exercises the spatial q-tiling path (HW=256, two 128-wide tiles).
    N, Cin, H, W, RC = 2, 8, 16, 16, 16
    x = jax.random.normal(k3, (N, Cin, H, W), jnp.float32)
    params = _make_params(k4, Cin, RC, H * W)
    _check(x, params, tile_p=128)

    print("KERNEL_OK")
</pallas_src>

<mosaic_0001>
module attributes {stable_mosaic.version = 11 : i64} {
  func.func @_reduce_hidden_kernel(%arg0: i32, %arg1: i32, %arg2: memref<1x8x64xf32, #tpu.memory_space<vmem>>, %arg3: memref<16x8xbf16, #tpu.memory_space<vmem>>, %arg4: memref<16x1xf32, #tpu.memory_space<vmem>>, %arg5: memref<16x1xf32, #tpu.memory_space<vmem>>, %arg6: memref<16x16xbf16, #tpu.memory_space<vmem>>, %arg7: memref<16x1xf32, #tpu.memory_space<vmem>>, %arg8: memref<16x1xf32, #tpu.memory_space<vmem>>, %arg9: memref<1x16x64xbf16, #tpu.memory_space<vmem>>, %arg10: memref<1x16x64xbf16, #tpu.memory_space<vmem>>) attributes {dimension_semantics = [#tpu.dimension_semantics<parallel>, #tpu.dimension_semantics<parallel>], iteration_bounds = array<i64: 2, 1>, scalar_prefetch = 0 : i64, scratch_operands = 0 : i64, tpu.core_type = #tpu.core_type<tc>, window_params = [{transform_indices = @transform_0, window_bounds = array<i64: 1, 8, 64>}, {pipeline_mode = #tpu.pipeline_mode<synchronous>, transform_indices = @transform_1, window_bounds = array<i64: 16, 8>}, {pipeline_mode = #tpu.pipeline_mode<synchronous>, transform_indices = @transform_2, window_bounds = array<i64: 16, 1>}, {pipeline_mode = #tpu.pipeline_mode<synchronous>, transform_indices = @transform_3, window_bounds = array<i64: 16, 1>}, {pipeline_mode = #tpu.pipeline_mode<synchronous>, transform_indices = @transform_4, window_bounds = array<i64: 16, 16>}, {pipeline_mode = #tpu.pipeline_mode<synchronous>, transform_indices = @transform_5, window_bounds = array<i64: 16, 1>}, {pipeline_mode = #tpu.pipeline_mode<synchronous>, transform_indices = @transform_6, window_bounds = array<i64: 16, 1>}, {transform_indices = @transform_7, window_bounds = array<i64: 1, 16, 64>}, {transform_indices = @transform_8, window_bounds = array<i64: 1, 16, 64>}]} {
    %c0 = arith.constant 0 : index
    %c0_0 = arith.constant 0 : index
    %c0_1 = arith.constant 0 : index
    %0 = vector.load %arg2[%c0, %c0_0, %c0_1] : memref<1x8x64xf32, #tpu.memory_space<vmem>>, vector<1x8x64xf32>
    %1 = vector.shape_cast %0 : vector<1x8x64xf32> to vector<8x64xf32>
    %2 = arith.truncf %1 : vector<8x64xf32> to vector<8x64xbf16>
    %c0_2 = arith.constant 0 : index
    %c0_3 = arith.constant 0 : index
    %3 = vector.load %arg3[%c0_2, %c0_3] : memref<16x8xbf16, #tpu.memory_space<vmem>>, vector<16x8xbf16>
    %cst = arith.constant dense<0.000000e+00> : vector<16x64xf32>
    %4 = tpu.matmul %3, %2, %cst {dimension_numbers = #tpu.dot_dimension_numbers<[1], [0], [0], [1], [0, 0, 1, 1], [], []>} : vector<16x8xbf16>, vector<8x64xbf16>, vector<16x64xf32> -> vector<16x64xf32>
    %c0_4 = arith.constant 0 : index
    %c0_5 = arith.constant 0 : index
    %5 = vector.load %arg4[%c0_4, %c0_5] : memref<16x1xf32, #tpu.memory_space<vmem>>, vector<16x1xf32>
    %6 = vector.broadcast %5 : vector<16x1xf32> to vector<16x64xf32>
    %7 = arith.mulf %4, %6 : vector<16x64xf32>
    %c0_6 = arith.constant 0 : index
    %c0_7 = arith.constant 0 : index
    %8 = vector.load %arg5[%c0_6, %c0_7] : memref<16x1xf32, #tpu.memory_space<vmem>>, vector<16x1xf32>
    %9 = vector.broadcast %8 : vector<16x1xf32> to vector<16x64xf32>
    %10 = arith.addf %7, %9 : vector<16x64xf32>
    %cst_8 = arith.constant 0.000000e+00 : f32
    %11 = vector.broadcast %cst_8 : f32 to vector<16x64xf32>
    %12 = arith.maximumf %10, %11 : vector<16x64xf32>
    %13 = arith.truncf %12 : vector<16x64xf32> to vector<16x64xbf16>
    %c0_9 = arith.constant 0 : index
    %c0_10 = arith.constant 0 : index
    %c0_11 = arith.constant 0 : index
    %14 = vector.load %arg9[%c0_9, %c0_10, %c0_11] : memref<1x16x64xbf16, #tpu.memory_space<vmem>>, vector<1x16x64xbf16>
    %15 = vector.shape_cast %14 : vector<1x16x64xbf16> to vector<16x64xbf16>
    %16 = vector.shape_cast %13 : vector<16x64xbf16> to vector<1x16x64xbf16>
    tpu.vector_store %arg9[%c0_9, %c0_10, %c0_11], %16 {strides = array<i32>} : memref<1x16x64xbf16, #tpu.memory_space<vmem>>, vector<1x16x64xbf16>,
    %c0_12 = arith.constant 0 : index
    %c0_13 = arith.constant 0 : index
    %17 = vector.load %arg6[%c0_12, %c0_13] : memref<16x16xbf16, #tpu.memory_space<vmem>>, vector<16x16xbf16>
    %cst_14 = arith.constant dense<0.000000e+00> : vector<16x64xf32>
    %18 = tpu.matmul %17, %13, %cst_14 {dimension_numbers = #tpu.dot_dimension_numbers<[1], [0], [0], [1], [0, 0, 1, 1], [], []>} : vector<16x16xbf16>, vector<16x64xbf16>, vector<16x64xf32> -> vector<16x64xf32>
    %c0_15 = arith.constant 0 : index
    %c0_16 = arith.constant 0 : index
    %19 = vector.load %arg7[%c0_15, %c0_16] : memref<16x1xf32, #tpu.memory_space<vmem>>, vector<16x1xf32>
    %20 = vector.broadcast %19 : vector<16x1xf32> to vector<16x64xf32>
    %21 = arith.mulf %18, %20 : vector<16x64xf32>
    %c0_17 = arith.constant 0 : index
    %c0_18 = arith.constant 0 : index
    %22 = vector.load %arg8[%c0_17, %c0_18] : memref<16x1xf32, #tpu.memory_space<vmem>>, vector<16x1xf32>
    %23 = vector.broadcast %22 : vector<16x1xf32> to vector<16x64xf32>
    %24 = arith.addf %21, %23 : vector<16x64xf32>
    %cst_19 = arith.constant 0.000000e+00 : f32
    %25 = vector.broadcast %cst_19 : f32 to vector<16x64xf32>
    %26 = arith.maximumf %24, %25 : vector<16x64xf32>
    %27 = arith.truncf %26 : vector<16x64xf32> to vector<16x64xbf16>
    %c0_20 = arith.constant 0 : index
    %c0_21 = arith.constant 0 : index
    %c0_22 = arith.constant 0 : index
    %28 = vector.load %arg10[%c0_20, %c0_21, %c0_22] : memref<1x16x64xbf16, #tpu.memory_space<vmem>>, vector<1x16x64xbf16>
    %29 = vector.shape_cast %28 : vector<1x16x64xbf16> to vector<16x64xbf16>
    %30 = vector.shape_cast %27 : vector<16x64xbf16> to vector<1x16x64xbf16>
    tpu.vector_store %arg10[%c0_20, %c0_21, %c0_22], %30 {strides = array<i32>} : memref<1x16x64xbf16, #tpu.memory_space<vmem>>, vector<1x16x64xbf16>,
    return
  }
  func.func @transform_0(%arg0: i32, %arg1: i32) -> (i32, i32, i32) {
    %c0_i32 = arith.constant 0 : i32
    %c0_i32_0 = arith.constant 0 : i32
    return %arg0, %c0_i32, %arg1 : i32, i32, i32
  }
  func.func @transform_1(%arg0: i32, %arg1: i32) -> (i32, i32) {
    %c0_i32 = arith.constant 0 : i32
    %c0_i32_0 = arith.constant 0 : i32
    %c0_i32_1 = arith.constant 0 : i32
    return %c0_i32, %c0_i32_0 : i32, i32
  }
  func.func @transform_2(%arg0: i32, %arg1: i32) -> (i32, i32) {
    %c0_i32 = arith.constant 0 : i32
    %c0_i32_0 = arith.constant 0 : i32
    %c0_i32_1 = arith.constant 0 : i32
    return %c0_i32, %c0_i32_0 : i32, i32
  }
  func.func @transform_3(%arg0: i32, %arg1: i32) -> (i32, i32) {
    %c0_i32 = arith.constant 0 : i32
    %c0_i32_0 = arith.constant 0 : i32
    %c0_i32_1 = arith.constant 0 : i32
    return %c0_i32, %c0_i32_0 : i32, i32
  }
  func.func @transform_4(%arg0: i32, %arg1: i32) -> (i32, i32) {
    %c0_i32 = arith.constant 0 : i32
    %c0_i32_0 = arith.constant 0 : i32
    %c0_i32_1 = arith.constant 0 : i32
    return %c0_i32, %c0_i32_0 : i32, i32
  }
  func.func @transform_5(%arg0: i32, %arg1: i32) -> (i32, i32) {
    %c0_i32 = arith.constant 0 : i32
    %c0_i32_0 = arith.constant 0 : i32
    %c0_i32_1 = arith.constant 0 : i32
    return %c0_i32, %c0_i32_0 : i32, i32
  }
  func.func @transform_6(%arg0: i32, %arg1: i32) -> (i32, i32) {
    %c0_i32 = arith.constant 0 : i32
    %c0_i32_0 = arith.constant 0 : i32
    %c0_i32_1 = arith.constant 0 : i32
    return %c0_i32, %c0_i32_0 : i32, i32
  }
  func.func @transform_7(%arg0: i32, %arg1: i32) -> (i32, i32, i32) {
    %c0_i32 = arith.constant 0 : i32
    %c0_i32_0 = arith.constant 0 : i32
    return %arg0, %c0_i32, %arg1 : i32, i32, i32
  }
  func.func @transform_8(%arg0: i32, %arg1: i32) -> (i32, i32, i32) {
    %c0_i32 = arith.constant 0 : i32
    %c0_i32_0 = arith.constant 0 : i32
    return %arg0, %c0_i32, %arg1 : i32, i32, i32
  }
}

</mosaic_0001>

<bundles_post_ra>
// kernel: tpu_custom_call.1
= control target key start
LH: loop header
LB: loop body
LE: loop exit
PB: predicated region body
PF: predicated region fallthrough
CT: control target
= control target key end

     0   :  { %s1040_s0 = inlined_call_operand.vmem [shape: f32[2,8,64], index: 0, kind: input, shape index: {}]   ;;  %s1041_s1 = inlined_call_operand.vmem [shape: bf16[16,8], index: 1, kind: input, shape index: {}]   ;;  %s1042_s2 = inlined_call_operand.vmem [shape: f32[16,1], index: 2, kind: input, shape index: {}]   ;;  %s1043_s3 = inlined_call_operand.vmem [shape: f32[16,1], index: 3, kind: input, shape index: {}]   ;;  %s1044_s4 = inlined_call_operand.vmem [shape: bf16[16,16], index: 4, kind: input, shape index: {}]   ;;  %s1045_s5 = inlined_call_operand.vmem [shape: f32[16,1], index: 5, kind: input, shape index: {}]   ;;  %s1046_s6 = inlined_call_operand.vmem [shape: f32[16,1], index: 6, kind: input, shape index: {}]   ;;  %s1047_s7 = inlined_call_operand.hbm [shape: bf16[2,16,64], index: 7, kind: output, shape index: {0}]   ;;  %s1048_s8 = inlined_call_operand.hbm [shape: bf16[2,16,64], index: 8, kind: output, shape index: {1}]  }
   0x1   :  { %1050 = sst [smem:[#allocation8_spill]] %s1040_s0 }
   0x2   :  { %1051 = sst [smem:[#allocation9_spill]] %s1041_s1 }
   0x3   :  { %1052 = sst [smem:[#allocation10_spill]] %s1042_s2 }
   0x4   :  { %1053 = sst [smem:[#allocation11_spill]] %s1043_s3 }
   0x5   :  { %14 = vsyncpa [#allocation3], 0 }
   0x6   :  { %16 = vsyncpa [#allocation3 + $0x1], 0 }
   0x7   :  { %17 = vsyncpa [#allocation5], 0 }
   0x8   :  { %19 = vsyncpa [#allocation5 + $0x1], 0  ;;  %s877_s27 = smov 0   ;;  %s879_s28 = smov 0  }
   0x9   :  { %s881_s29 = smov 0   ;;  %s883_s30 = smov 0  }
   0xa   :  { %s885_s9 = smov 0   ;;  %s887_s10 = smov 0  }
   0xb LB: > { %s621_s11 = sadd.s32 4294967295, %s827_s10   ;;  %s622_s12 = sadd.s32 4294967294, %s827_s10   ;;  %s827_s10 = sphi %s887_s10, %s25_s10   ;;  %s823_s9 = sphi %s885_s9, %s1065_s9   ;;  %s819_s30 = sphi %s883_s30, %s1064_s30   ;;  %s815_s29 = sphi %s881_s29, %s1063_s29   ;;  %s811_s28 = sphi %s879_s28, %s1062_s28   ;;  %s807_s27 = sphi %s877_s27, %s1061_s27  }
   0xc   : > { %s37_s13 = sadd.s32 1, %s823_s9  ;;  %s200_s14 = sadd.s32 1, %s815_s29 }
   0xd   : > { %p39_p0 = scmp.ge.s32.totalorder %s37_s13, 2  ;;  %p210_p1 = scmp.ne.s32.totalorder %s815_s29, %s811_s28 }
   0xe   : > { %p211_p2 = scmp.eq.s32.totalorder %s621_s11, 1  ;;  %p216_p3 = scmp.ne.s32.totalorder %s811_s28, %s807_s27 }
   0xf   : > { %s1067_s13 = smov (%p39_p0, %s37_s13), 0  ;;  %p217_p5 = scmp.eq.s32.totalorder %s622_s12, 1 }
  0x10   : > { %p917_p4 = por %p211_p2, %p210_p1  ;;  %s195_s16 = ssub.s32 %s823_s9, %s1067_s13 }
  0x11   : > { %p625_p6 = scmp.ge.s32.totalorder %s827_s10, 1  ;;  %p198_p7 = scmp.eq.s32.totalorder %s195_s16, 0 }
  0x12   : > { %p924_p8 = por %p217_p5, %p216_p3  ;;  %p291_p9 = scmp.lt.s32.totalorder %s827_s10, 3 }
  0x13   : > { %s930_s18 = scalar_select %p198_p7, %s815_s29, %s200_s14  }
  0x14   : > { %p292_p10 = pnand %p625_p6, %p291_p9 }
  0x15   : > { %s1056_s2 = sld [smem:[#allocation10_spill]] (!%p292_p10)  ;;  %p332_p11 = scmp.lt.s32.totalorder (!%p292_p10), %s819_s30, 1 }
  0x16   : > { %295 = sbr.rel (%p292_p10) target bundleno = 332 (0x14c), region = 48  ;;  %s1057_s3 = sld [smem:[#allocation11_spill]] (!%p292_p10) }
  0x17   : > { %s1058_s0 = sld [smem:[#allocation8_spill]] (!%p292_p10)  ;;  %s965_s16 = sand.u32 (!%p292_p10), 1, %s811_s28  }
  0x18   : > { %s1059_s1 = sld [smem:[#allocation9_spill]] (!%p292_p10)  ;;  %s1049_s19 = sshll.u32 (!%p292_p10), %s965_s16, 3 }
  0x19   : > { %s324_s20 = scalar_lea.vmem (!%p292_p10), [#allocation2], %s1049_s19  ;;  %s472_s14 = scalar_lea.sflag (!%p292_p10), [#allocation3], %s965_s16 }
  0x1b   : > { %v371_v0 = vld [vmem:[%s1056_s2] sm:$0xff]  ;;  %v829_v2 = vmov 0   ;;  %s333_s23 = scalar_select %p332_p11, %s819_s30, 1  ;;  %vm353_vm0 = vcmask 1043456   ;;  %v372_v5 = vld [vmem:[%s1056_s2 + $0x8] sm:$0xff]  ;;  %vm349_vm1 = vcmask 64512  }
  0x1c   : > { %v385_v1 = vld [vmem:[%s1057_s3] sm:$0xff]  ;;  %714 = vset.pattern.permute.xlu0 %v829_v2  ;;  %715 = vset.pattern.permute.xlu1 %v829_v2  ;;  %v386_v6 = vld [vmem:[%s1057_s3 + $0x8] sm:$0xff]  ;;  %vm403_vm2 = vcmask 519168   ;;  %vm419_vm3 = vcmask 130048  }
  0x1d   : > { %375 = vperm.xlu0 %714, %v371_v0   ;;  %389 = vperm.xlu1 %715, %v385_v1   ;;  %s628_s24 = sshll.u32 %s333_s23, 3  ;;  %v451_v9 = vld [vmem:[%s1046_s6] sm:$0xff]  ;;  %v452_v10 = vld [vmem:[%s1046_s6 + $0x8] sm:$0xff]  ;;  %s649_s23 = sshll.u32 %s819_s30, 3 }
  0x1e   : > { %716 = vset.pattern.permute.xlu2 %v829_v2  ;;  %s338_s11 = scalar_lea.vmem %s1058_s0, %s628_s24  ;;  %v647_v8 = vld [vmem:[%s1059_s1] sm:$0xff]  ;;  %v438_v13 = vld [vmem:[%s1045_s5 + $0x8] sm:$0xff]  ;;  %s489_s26 = scalar_lea.hbm %s1047_s7, %s649_s23 }
  0x1f   : > { %v340_v3 = vld [vmem:[%s338_s11] sm:$0xff]  ;;  %s490_s11 = sshll.u32 %s324_s20, 4  ;;  %s492_s12 = sshll.u32 %s489_s26, 4  ;;  %s491_s11 = int_to_ptr.vmem [resolvable:$true] %s490_s11  ;;  %s493_s12 = int_to_ptr.hbm [resolvable:$true] %s492_s12 }
  0x20   : > { %v341_v4 = vpack.c.bf16 %v340_v3, %v340_v3  ;;  %v437_v11 = vld [vmem:[%s1045_s5] sm:$0xff]  ;;  %s731_s19 = sshra.s32 %s493_s12, 4  ;;  %s737_s1 = scalar_lea.hbm %s1047_s7, 16  ;;  %s732_s19 = int_to_ptr.hbm [resolvable:$true] %s731_s19 }
  0x21   : > { %441 = vperm.xlu2 %716, %v437_v11   ;;  %v648_v30 = vld [vmem:[%s1044_s4] sm:$0xff]  ;;  %s733_s0 = scalar_lea.hbm %s732_s19, 8  ;;  %p738_p1 = scmp.lt.s32.totalorder %s732_s19, %s1047_s7 }
  0x22   : > { %v355_v7 = vsel %vm353_vm0, %v341_v4, 0  ;;  %p734_p12 = scmp.ne.s32.totalorder %s732_s19, %s733_s0  ;;  %p739_p2 = scmp.lt.s32.totalorder %s737_s1, %s733_s0 }
  0x23   : > { %364 = vmatpush.bf16.msra.mxu0 %v355_v7 }
  0x24   : > { %p735_p13 = pnand %p734_p12, %p917_p4  ;;  %p740_p3 = por %p739_p2, %p738_p1 }
  0x25   : > { %380 = vperm.xlu0 %714, %v372_v5   ;;  %394 = vperm.xlu1 %715, %v386_v6  }
  0x26   : > { %633 = vmatmul.msk.bf16.vlgmr.msra.gmra.mxu0 %vm349_vm1, %v647_v8  ;;  %p736_p0 = pneg %p735_p13 }
  0x28   : > { %p741_p5 = pnand %p740_p3, %p736_p0 }
  0x29   : > { %446 = vperm.xlu2 %716, %v438_v13  }
  0x2d   : > { %455 = vperm.xlu0 %714, %v451_v9   ;;  %460 = vperm.xlu1 %715, %v452_v10  }
  0x8f   : > { %v376_v12 = vpop.permute.xlu0 %375  ;;  %v390_v14 = vpop.permute.xlu1 %389 }
  0x97   : > { %v381_v20 = vpop.permute.xlu0 %380  ;;  %v395_v23 = vpop.permute.xlu1 %394 }
  0xa3   : > { %v366_v15 = vpop.f32.mrf.mxu0 }
  0xa4   : > { %v383_v16 = vmul.f32 %v376_v12, %v366_v15 }
  0xa6   : > { %v397_v17 = vadd.f32 %v390_v14, %v383_v16 }
  0xa8   : > { %v399_v18 = vmax.f32 %v397_v17, 0.0 }
  0xaa   : > { %v401_v19 = vpack.c.bf16 %v399_v18, %v399_v18 }
  0xab   : > { %v368_v21 = vpop.f32.mrf.mxu0 }
  0xac   : > { %404 = vst.msk [vmem:[%s324_s20] sm:$0xf] %vm403_vm2, %v401_v19  ;;  %v384_v22 = vmul.f32 %v381_v20, %v368_v21  ;;  %v415_v27 = vunpack.c.l.b16 %v401_v19 }
  0xae   : > { %v398_v24 = vadd.f32 %v395_v23, %v384_v22 }
  0xb0   : > { %v400_v25 = vmax.f32 %v398_v24, 0.0 }
  0xb2   : > { %v402_v26 = vpack.c.bf16 %v400_v25, %v400_v25 }
  0xb4   : > { %405 = vst.msk [vmem:[%s324_s20 + $0x4] sm:$0xf] %vm403_vm2, %v402_v26  ;;  %v416_v28 = vunpack.c.l.b16 %v402_v26 }
  0xb6   : > { %v417_v29 = vpack.c.b16 %v416_v28, %v415_v27 }
  0xb8   : > { %430 = vmatpush.bf16.msra.mxu1 %v417_v29 }
  0xbb   : > { %638 = vmatmul.msk.bf16.vlgmr.msra.gmra.mxu1 %vm419_vm3, %v648_v30 }
  0xbc   : > { %744 = shalt.err (!%p741_p5)
}
  0xbd   : > { %s830_s20 = smov 64   ;;  %s831_s24 = smov 4   ;;  %v442_v31 = vpop.permute.xlu2 %441  ;;  %v456_v34 = vpop.permute.xlu0 %455 }
  0xbe   : > { %651 = dma.vmem_to_hbm [thread:$0]  (%p917_p4), %s491_s11, 128, %s493_s12, %s472_s14, %s830_s20, %s830_s20, %s831_s24   ;;  %v461_v41 = vpop.permute.xlu1 %460 }
  0xbf   : > { %s1060_s0 = sshll.u32 %s965_s16, 3  ;;  %s507_s19 = scalar_lea.hbm %s1048_s8, %s649_s23 }
  0xc0   : > { %s331_s1 = scalar_lea.vmem [#allocation4], %s1060_s0  ;;  %s510_s26 = sshll.u32 %s507_s19, 4  ;;  %s511_s26 = int_to_ptr.hbm [resolvable:$true] %s510_s26 }
  0xc1   : > { %s508_s25 = sshll.u32 %s331_s1, 4  ;;  %s477_s11 = scalar_lea.sflag [#allocation5], %s965_s16  ;;  %s509_s25 = int_to_ptr.vmem [resolvable:$true] %s508_s25 }
  0xc2   : > { %s759_s12 = sshra.s32 %s511_s26, 4  ;;  %s765_s21 = scalar_lea.hbm %s1048_s8, 16  ;;  %s760_s12 = int_to_ptr.hbm [resolvable:$true] %s759_s12 }
  0xc3   : > { %s761_s14 = scalar_lea.hbm %s760_s12, 8  ;;  %p766_p10 = scmp.lt.s32.totalorder %s760_s12, %s1048_s8 }
  0xc4   : > { %p762_p6 = scmp.ne.s32.totalorder %s760_s12, %s761_s14  ;;  %p767_p11 = scmp.lt.s32.totalorder %s765_s21, %s761_s14 }
  0xc5   : > { %v447_v38 = vpop.permute.xlu2 %446 }
  0xc6   : > { %p763_p7 = pnand %p762_p6, %p917_p4  ;;  %p768_p12 = por %p767_p11, %p766_p10 }
  0xc8   : > { %p764_p9 = pneg %p763_p7 }
  0xca   : > { %p769_p13 = pnand %p768_p12, %p764_p9 }
 0x138   : > { %v432_v32 = vpop.f32.mrf.mxu1 }
 0x139   : > { %v449_v33 = vmul.f32 %v442_v31, %v432_v32 }
 0x13b   : > { %v463_v35 = vadd.f32 %v456_v34, %v449_v33 }
 0x13d   : > { %v465_v36 = vmax.f32 %v463_v35, 0.0 }
 0x13f   : > { %v467_v37 = vpack.c.bf16 %v465_v36, %v465_v36 }
 0x140   : > { %v434_v39 = vpop.f32.mrf.mxu1 }
 0x141   : > { %469 = vst.msk [vmem:[%s331_s1] sm:$0xf] %vm403_vm2, %v467_v37  ;;  %v450_v40 = vmul.f32 %v447_v38, %v434_v39 }
 0x143   : > { %v464_v42 = vadd.f32 %v461_v41, %v450_v40 }
 0x145   : > { %v466_v43 = vmax.f32 %v464_v42, 0.0 }
 0x147   : > { %v468_v44 = vpack.c.bf16 %v466_v43, %v466_v43 }
 0x149   : > { %470 = vst.msk [vmem:[%s331_s1 + $0x4] sm:$0xf] %vm403_vm2, %v468_v44 }
 0x14a   : > { %772 = shalt.err (!%p769_p13)
}
 0x14b   : > { %652 = dma.vmem_to_hbm [thread:$0]  (%p917_p4), %s509_s25, 128, %s511_s26, %s477_s11, %s830_s20, %s830_s20, %s831_s24  }
 0x14c PF: > { %p662_p0 = scmp.ge.s32.totalorder %s827_s10, 2  ;;  %s525_s16 = sand.u32 1, %s807_s27  }
 0x14d   : > { %s526_s1 = scalar_lea.sflag [#allocation3], %s525_s16 }
 0x14e   : > { %p656_p1 = pnand %p662_p0, %p924_p8 }
 0x150   : > { %p657_p2 = pneg %p656_p1 }
 0x152   : > { %798 = dma.done.wait (%p657_p2), %s526_s1, 128  }
 0x153   : > { %800 = vsyncadd (%p657_p2), %s526_s1, 4294967168  ;;  %s536_s2 = scalar_lea.sflag [#allocation5], %s525_s16 }
 0x154   : > { %802 = dma.done.wait (%p657_p2), %s536_s2, 128  }
 0x155   : > { %804 = vsyncadd (%p657_p2), %s536_s2, 4294967168  ;;  %s25_s10 = sadd.s32 1, %s827_s10   ;;  %s1061_s27 = smov %s811_s28 }
 0x156   : > { %p22_p3 = scmp.ge.s32.totalorder %s25_s10, 4   ;;  %s1062_s28 = smov %s815_s29 }
 0x157   : > { %s1063_s29 = smov %s930_s18  ;;  %s1064_s30 = smov %s823_s9 }
 0x158   : > { %s1065_s9 = smov %s1067_s13  ;;  %24 = sbr.rel (!%p22_p3) target bundleno = 11 (0xb), region = 100 }
 0x15d   :  { %542 = vsyncpa [#allocation3], 1 }
 0x15e   :  { %544 = vsyncpa [#allocation3 + $0x1], 1 }
 0x15f   :  { %545 = vsyncpa [#allocation5], 1 }
 0x160   :  { %547 = vsyncpa [#allocation5 + $0x1], 1 }

</bundles_post_ra>
